<compile_context>
chip_gen: v7x
topology: tpu7x:2x2x1
jax: 0.10.0
libtpu: 0.0.40
codegen_flags: <defaults>
</compile_context>

<pallas_src>
import jax
import jax.numpy as jnp
from jax.experimental import pallas as pl
from jax.experimental.pallas import tpu as pltpu


def _round_up(x, m):
    return (x + m - 1) // m * m


def _cdiv(a, b):
    return (a + b - 1) // b


def _vmem_budget_bytes():
    """~75% of physical VMEM: ~96 MiB on v5e/v6e (128 MiB), ~48 MiB on v7x (64 MiB)."""
    try:
        cap = int(pltpu.get_tpu_info().vmem_capacity_bytes)
    except Exception:
        cap = 64 << 20  # conservative fallback == v7x per-TC physical VMEM
    return max(32 << 20, (cap * 3) // 4)


def ffn_fused_kernel(x_ref, w1_ref, b1_ref, w2_ref, b2_ref, o_ref):
    # Full d_ff in one step: no accumulator, no init/finalize pl.when passes.
    # Operands stay in their native dtype (bf16 -> full-rate MXU); f32 acc.
    h = jnp.dot(x_ref[...], w1_ref[...], preferred_element_type=jnp.float32)
    h = jnp.maximum(h + b1_ref[...].astype(jnp.float32), 0.0)
    y = jnp.dot(h.astype(w2_ref.dtype), w2_ref[...],
                preferred_element_type=jnp.float32)
    o_ref[...] = (y + b2_ref[...].astype(jnp.float32)).astype(o_ref.dtype)


def ffn_reduce_kernel(x_ref, w1_ref, b1_ref, w2_ref, b2_ref, o_ref, acc_ref):
    # d_ff split across grid axis 1; f32 accumulator resident in VMEM.
    k = pl.program_id(1)
    h = jnp.dot(x_ref[...], w1_ref[...], preferred_element_type=jnp.float32)
    h = jnp.maximum(h + b1_ref[...].astype(jnp.float32), 0.0)
    partial = jnp.dot(h.astype(w2_ref.dtype), w2_ref[...],
                      preferred_element_type=jnp.float32)

    @pl.when(k == 0)
    def _first():
        # First k step writes directly (saves the zero-fill store pass) and
        # folds the b2 add here instead of a separate finalize add.
        acc_ref[...] = partial + b2_ref[...].astype(jnp.float32)

    @pl.when(k > 0)
    def _rest():
        acc_ref[...] += partial

    @pl.when(k == pl.num_programs(1) - 1)
    def _finalize():
        o_ref[...] = acc_ref[...].astype(o_ref.dtype)


def position_wise_ffn(x, w1, b1, w2, b2, *, tm_max=512, tf=None,
                      compute_dtype=None, force_reduce=False):
    """y = relu(x @ w1 + b1) @ w2 + b2.   x: (..., d_model).

    Weights are stored (in, out) == PyTorch weight.T.
    compute_dtype=jnp.bfloat16 casts operands once at the wrapper boundary for
    full-rate MXU throughput (f32 accumulation kept); output keeps x's dtype.
    """
    orig_shape = x.shape
    out_dtype = x.dtype
    d_model = x.shape[-1]
    d_ff = w1.shape[1]
    assert w1.shape == (d_model, d_ff)
    assert w2.shape == (d_ff, d_model)
    assert b1.shape == (d_ff,) and b2.shape == (d_model,)

    if compute_dtype is not None:
        x = x.astype(compute_dtype)
        w1 = w1.astype(compute_dtype)
        b1 = b1.astype(compute_dtype)
        w2 = w2.astype(compute_dtype)
        b2 = b2.astype(compute_dtype)

    M = 1
    for s in orig_shape[:-1]:
        M *= s
    x2d = x.reshape(M, d_model)

    in_sz = x2d.dtype.itemsize
    w_sz = w1.dtype.itemsize
    out_sz = jnp.dtype(out_dtype).itemsize

    # ---- row tiling: balance tile size against M (low padding waste) and
    #      keep >= 2 row tiles when possible so v7x's two TensorCores both
    #      get work on the "parallel" axis (harmless on 1-TC chips).
    n_row = _cdiv(M, tm_max)
    if n_row == 1 and M >= 16:
        n_row = 2
    tm = _round_up(_cdiv(M, n_row), 8)
    M_pad = tm * n_row
    if M_pad != M:
        x2d = jnp.pad(x2d, ((0, M_pad - M), (0, 0)))

    budget = _vmem_budget_bytes()

    def fused_vmem(tm_, weight_bufs):
        return (2 * tm_ * d_model * in_sz                               # x (dbl buf)
                + weight_bufs * (2 * d_model * d_ff + d_ff + d_model) * w_sz
                + 2 * tm_ * d_model * out_sz                            # out (dbl buf)
                + tm_ * d_ff * (4 + w_sz)                               # h f32 + cast
                + tm_ * d_model * 4)                                    # fc2 f32 result

    def reduce_vmem(tm_, tf_):
        return (2 * tm_ * d_model * in_sz
                + 2 * (2 * d_model * tf_ + tf_ + d_model) * w_sz
                + 2 * tm_ * d_model * out_sz
                + tm_ * d_model * 4                                     # acc scratch
                + tm_ * tf_ * (4 + w_sz)
                + tm_ * d_model * 4)

    weight_bufs = None
    if not force_reduce:
        for bufs in (2, 1):  # prefer double-buffered weights; else VMEM-resident
            if fused_vmem(tm, bufs) <= budget:
                weight_bufs = bufs
                break

    flops = 4 * M_pad * d_model * d_ff  # two matmuls, 2*M*N*K each

    if weight_bufs is not None:
        # ---------------- fused path: tf == d_ff, grid = (row tiles,) -------
        b1_2d = b1.reshape(1, d_ff)
        b2_2d = b2.reshape(1, d_model)

        def const_spec(shape):
            if weight_bufs == 1:
                # single-buffer the resident weights (v7x 64 MiB VMEM).
                return pl.BlockSpec(shape, lambda i: (0, 0),
                                    pipeline_mode=pl.Buffered(1))
            return pl.BlockSpec(shape, lambda i: (0, 0))

        weight_bytes = (2 * d_model * d_ff + d_ff + d_model) * w_sz
        cost = pl.CostEstimate(
            flops=flops, transcendentals=0,
            bytes_accessed=M_pad * d_model * (in_sz + out_sz) + weight_bytes)

        out = pl.pallas_call(
            ffn_fused_kernel,
            out_shape=jax.ShapeDtypeStruct((M_pad, d_model), out_dtype),
            grid_spec=pltpu.PrefetchScalarGridSpec(
                num_scalar_prefetch=0,
                grid=(n_row,),
                in_specs=[
                    pl.BlockSpec((tm, d_model), lambda i: (i, 0)),   # x rows
                    const_spec((d_model, d_ff)),                     # W1 (resident)
                    const_spec((1, d_ff)),                           # b1
                    const_spec((d_ff, d_model)),                     # W2 (resident)
                    const_spec((1, d_model)),                        # b2
                ],
                out_specs=pl.BlockSpec((tm, d_model), lambda i: (i, 0)),
            ),
            compiler_params=pltpu.CompilerParams(
                dimension_semantics=("parallel",),
                vmem_limit_bytes=budget),
            cost_estimate=cost,
        )(x2d, w1, b1_2d, w2, b2_2d)
    else:
        # -------- reduction fallback: d_ff tiled, f32 VMEM accumulator ------
        if tf is None:
            tf_ = max(128, min(_round_up(d_ff, 128), 1024))
            while tf_ > 128 and reduce_vmem(tm, tf_) > budget:
                tf_ -= 128
        else:
            tf_ = max(128, min((tf // 128) * 128, _round_up(d_ff, 128)))
        d_ff_pad = _round_up(d_ff, tf_)
        if d_ff_pad != d_ff:
            # padded hidden units contribute exactly zero: relu(0 + 0) @ 0 == 0
            w1 = jnp.pad(w1, ((0, 0), (0, d_ff_pad - d_ff)))
            b1 = jnp.pad(b1, ((0, d_ff_pad - d_ff),))
            w2 = jnp.pad(w2, ((0, d_ff_pad - d_ff), (0, 0)))
        b1_2d = b1.reshape(1, d_ff_pad)
        b2_2d = b2.reshape(1, d_model)
        n_ff = d_ff_pad // tf_

        weight_bytes = (2 * d_model * d_ff_pad + d_ff_pad + d_model) * w_sz
        cost = pl.CostEstimate(
            flops=flops, transcendentals=0,
            # weights are re-streamed from HBM once per row tile in this layout
            bytes_accessed=(M_pad * d_model * (in_sz + out_sz)
                            + n_row * weight_bytes))

        out = pl.pallas_call(
            ffn_reduce_kernel,
            out_shape=jax.ShapeDtypeStruct((M_pad, d_model), out_dtype),
            grid_spec=pltpu.PrefetchScalarGridSpec(
                num_scalar_prefetch=0,
                grid=(n_row, n_ff),                       # reduction axis last
                in_specs=[
                    pl.BlockSpec((tm, d_model), lambda i, k: (i, 0)),   # x rows
                    pl.BlockSpec((d_model, tf_), lambda i, k: (0, k)),  # W1 tile
                    pl.BlockSpec((1, tf_), lambda i, k: (0, k)),        # b1 tile
                    pl.BlockSpec((tf_, d_model), lambda i, k: (k, 0)),  # W2 tile
                    pl.BlockSpec((1, d_model), lambda i, k: (0, 0)),    # b2
                ],
                out_specs=pl.BlockSpec((tm, d_model), lambda i, k: (i, 0)),
                scratch_shapes=[pltpu.VMEM((tm, d_model), jnp.float32)],
            ),
            compiler_params=pltpu.CompilerParams(
                dimension_semantics=("parallel", "arbitrary"),
                vmem_limit_bytes=budget),
            cost_estimate=cost,
        )(x2d, w1, b1_2d, w2, b2_2d)

    return out[:M].reshape(orig_shape)


def init_params(key, d_model, d_ff, dtype=jnp.float32):
    """Deterministic init matching nn.Linear shapes (uniform-bound style).
    Weights stored as (in, out) == PyTorch weight.T"""
    k1, k2, k3, k4 = jax.random.split(key, 4)
    bound1 = 1.0 / (d_model ** 0.5)
    bound2 = 1.0 / (d_ff ** 0.5)
    w1 = jax.random.uniform(k1, (d_model, d_ff), dtype, -bound1, bound1)
    b1 = jax.random.uniform(k2, (d_ff,), dtype, -bound1, bound1)
    w2 = jax.random.uniform(k3, (d_ff, d_model), dtype, -bound2, bound2)
    b2 = jax.random.uniform(k4, (d_model,), dtype, -bound2, bound2)
    return w1, b1, w2, b2


if __name__ == "__main__":
    key = jax.random.PRNGKey(0)
    kx, kp = jax.random.split(key)

    # Small, lane-aligned shapes (d_model, d_ff multiples of 128).
    batch, seq, d_model, d_ff = 2, 8, 128, 256
    x = jax.random.normal(kx, (batch, seq, d_model), jnp.float32)
    w1, b1, w2, b2 = init_params(kp, d_model, d_ff)

    # Reference in plain JAX (same math as fc2(relu(fc1(x))))
    ref = jnp.maximum(x @ w1 + b1, 0.0) @ w2 + b2

    # 1) Default path: fused kernel (full d_ff per step, weights VMEM-resident),
    #    row axis split into 2 "parallel" tiles.
    y = jax.block_until_ready(position_wise_ffn(x, w1, b1, w2, b2))
    assert y.shape == x.shape
    assert jnp.allclose(y, ref, atol=1e-3, rtol=1e-3), "mismatch (fused path)"

    # 2) Reduction fallback path: exercises the k==0 write / accumulate /
    #    finalize logic with a multi-step d_ff grid axis.
    y2 = jax.block_until_ready(
        position_wise_ffn(x, w1, b1, w2, b2, tm_max=8, tf=128, force_reduce=True))
    assert jnp.allclose(y2, ref, atol=1e-3, rtol=1e-3), "mismatch (reduce path)"

    # 3) bf16 MXU path: operands cast once at the boundary, f32 accumulation.
    y3 = jax.block_until_ready(
        position_wise_ffn(x, w1, b1, w2, b2, compute_dtype=jnp.bfloat16))
    assert y3.dtype == x.dtype
    assert jnp.allclose(y3, ref, atol=5e-2, rtol=5e-2), "mismatch (bf16 path)"

    print("KERNEL_OK")
</pallas_src>

<mosaic_0001>
module attributes {stable_mosaic.version = 11 : i64} {
  func.func @ffn_fused_kernel(%arg0: i32, %arg1: memref<8x128xf32, #tpu.memory_space<vmem>>, %arg2: memref<128x256xf32, #tpu.memory_space<vmem>>, %arg3: memref<1x256xf32, #tpu.memory_space<vmem>>, %arg4: memref<256x128xf32, #tpu.memory_space<vmem>>, %arg5: memref<1x128xf32, #tpu.memory_space<vmem>>, %arg6: memref<8x128xf32, #tpu.memory_space<vmem>>) attributes {dimension_semantics = [#tpu.dimension_semantics<parallel>], iteration_bounds = array<i64: 2>, scalar_prefetch = 0 : i64, scratch_operands = 0 : i64, tpu.core_type = #tpu.core_type<tc>, window_params = [{transform_indices = @transform_0, window_bounds = array<i64: 8, 128>}, {pipeline_mode = #tpu.pipeline_mode<synchronous>, transform_indices = @transform_1, window_bounds = array<i64: 128, 256>}, {pipeline_mode = #tpu.pipeline_mode<synchronous>, transform_indices = @transform_2, window_bounds = array<i64: 1, 256>}, {pipeline_mode = #tpu.pipeline_mode<synchronous>, transform_indices = @transform_3, window_bounds = array<i64: 256, 128>}, {pipeline_mode = #tpu.pipeline_mode<synchronous>, transform_indices = @transform_4, window_bounds = array<i64: 1, 128>}, {transform_indices = @transform_5, window_bounds = array<i64: 8, 128>}]} {
    %c0 = arith.constant 0 : index
    %c0_0 = arith.constant 0 : index
    %0 = vector.load %arg1[%c0, %c0_0] : memref<8x128xf32, #tpu.memory_space<vmem>>, vector<8x128xf32>
    %c0_1 = arith.constant 0 : index
    %c0_2 = arith.constant 0 : index
    %1 = vector.load %arg2[%c0_1, %c0_2] : memref<128x256xf32, #tpu.memory_space<vmem>>, vector<128x256xf32>
    %cst = arith.constant dense<0.000000e+00> : vector<8x256xf32>
    %2 = tpu.matmul %0, %1, %cst {dimension_numbers = #tpu.dot_dimension_numbers<[1], [0], [0], [1], [0, 0, 1, 1], [], []>} : vector<8x128xf32>, vector<128x256xf32>, vector<8x256xf32> -> vector<8x256xf32>
    %c0_3 = arith.constant 0 : index
    %c0_4 = arith.constant 0 : index
    %3 = vector.load %arg3[%c0_3, %c0_4] : memref<1x256xf32, #tpu.memory_space<vmem>>, vector<1x256xf32>
    %4 = vector.broadcast %3 : vector<1x256xf32> to vector<8x256xf32>
    %5 = arith.addf %2, %4 : vector<8x256xf32>
    %cst_5 = arith.constant 0.000000e+00 : f32
    %6 = vector.broadcast %cst_5 : f32 to vector<8x256xf32>
    %7 = arith.maximumf %5, %6 : vector<8x256xf32>
    %c0_6 = arith.constant 0 : index
    %c0_7 = arith.constant 0 : index
    %8 = vector.load %arg4[%c0_6, %c0_7] : memref<256x128xf32, #tpu.memory_space<vmem>>, vector<256x128xf32>
    %cst_8 = arith.constant dense<0.000000e+00> : vector<8x128xf32>
    %9 = tpu.matmul %7, %8, %cst_8 {dimension_numbers = #tpu.dot_dimension_numbers<[1], [0], [0], [1], [0, 0, 1, 1], [], []>} : vector<8x256xf32>, vector<256x128xf32>, vector<8x128xf32> -> vector<8x128xf32>
    %c0_9 = arith.constant 0 : index
    %c0_10 = arith.constant 0 : index
    %10 = vector.load %arg5[%c0_9, %c0_10] : memref<1x128xf32, #tpu.memory_space<vmem>>, vector<1x128xf32>
    %11 = vector.broadcast %10 : vector<1x128xf32> to vector<8x128xf32>
    %12 = arith.addf %9, %11 : vector<8x128xf32>
    %c0_11 = arith.constant 0 : index
    %c0_12 = arith.constant 0 : index
    %13 = vector.load %arg6[%c0_11, %c0_12] : memref<8x128xf32, #tpu.memory_space<vmem>>, vector<8x128xf32>
    tpu.vector_store %arg6[%c0_11, %c0_12], %12 {strides = array<i32>} : memref<8x128xf32, #tpu.memory_space<vmem>>, vector<8x128xf32>,
    return
  }
  func.func @transform_0(%arg0: i32) -> (i32, i32) {
    %c0_i32 = arith.constant 0 : i32
    %c0_i32_0 = arith.constant 0 : i32
    return %arg0, %c0_i32 : i32, i32
  }
  func.func @transform_1(%arg0: i32) -> (i32, i32) {
    %c0_i32 = arith.constant 0 : i32
    %c0_i32_0 = arith.constant 0 : i32
    %c0_i32_1 = arith.constant 0 : i32
    return %c0_i32, %c0_i32_0 : i32, i32
  }
  func.func @transform_2(%arg0: i32) -> (i32, i32) {
    %c0_i32 = arith.constant 0 : i32
    %c0_i32_0 = arith.constant 0 : i32
    %c0_i32_1 = arith.constant 0 : i32
    return %c0_i32, %c0_i32_0 : i32, i32
  }
  func.func @transform_3(%arg0: i32) -> (i32, i32) {
    %c0_i32 = arith.constant 0 : i32
    %c0_i32_0 = arith.constant 0 : i32
    %c0_i32_1 = arith.constant 0 : i32
    return %c0_i32, %c0_i32_0 : i32, i32
  }
  func.func @transform_4(%arg0: i32) -> (i32, i32) {
    %c0_i32 = arith.constant 0 : i32
    %c0_i32_0 = arith.constant 0 : i32
    %c0_i32_1 = arith.constant 0 : i32
    return %c0_i32, %c0_i32_0 : i32, i32
  }
  func.func @transform_5(%arg0: i32) -> (i32, i32) {
    %c0_i32 = arith.constant 0 : i32
    %c0_i32_0 = arith.constant 0 : i32
    return %arg0, %c0_i32 : i32, i32
  }
}

</mosaic_0001>

<bundles_post_ra>
// kernel: tpu_custom_call.1
= control target key start
LH: loop header
LB: loop body
LE: loop exit
PB: predicated region body
PF: predicated region fallthrough
CT: control target
= control target key end

     0   :  { %10 = vsyncpa [#allocation3], 0  ;;  %s1227_s0 = inlined_call_operand.hbm [shape: f32[16,128], index: 0, kind: input, shape index: {}]   ;;  %s1228_s1 = inlined_call_operand.hbm [shape: f32[128,256], index: 1, kind: input, shape index: {}]   ;;  %s1229_s2 = inlined_call_operand.vmem [shape: f32[1,256], index: 2, kind: input, shape index: {}]   ;;  %s1230_s3 = inlined_call_operand.hbm [shape: f32[256,128], index: 3, kind: input, shape index: {}]   ;;  %s1231_s4 = inlined_call_operand.vmem [shape: f32[1,128], index: 4, kind: input, shape index: {}]   ;;  %s1232_s5 = inlined_call_operand.hbm [shape: f32[16,128], index: 5, kind: output, shape index: {}]  }
   0x1   :  { %12 = vsyncpa [#allocation3 + $0x1], 0 }
   0x2   :  { %13 = vsyncpa [#allocation6], 0 }
   0x3   :  { %14 = vsyncpa [#allocation4], 0 }
   0x4   :  { %16 = vsyncpa [#allocation4 + $0x1], 0  ;;  %s985_s18 = smov 0   ;;  %s987_s19 = smov 0  }
   0x5   :  { %s989_s20 = smov 0   ;;  %s991_s21 = smov 0  }
   0x6 LB: > { %s1006_s22 = sadd.s32 4294967295, %s944_s21   ;;  %s600_s23 = sadd.s32 4294967294, %s944_s21   ;;  %s944_s21 = sphi %s991_s21, %s1252_s21   ;;  %s940_s20 = sphi %s989_s20, %s1251_s20   ;;  %s936_s19 = sphi %s987_s19, %s1250_s19   ;;  %s932_s18 = sphi %s985_s18, %s1249_s18  }
   0x7   : > { %p42_p0 = scmp.ne.s32.totalorder %s936_s19, %s932_s18  ;;  %p1233_p1 = scmp.eq.s32.totalorder %s1006_s22, 0 }
   0x8   : > { %p156_p3 = scmp.eq.s32.totalorder %s600_s23, 1  ;;  %p601_p5 = scmp.ge.s32.totalorder %s944_s21, 1 }
   0x9   : > { %p1015_p4 = por %p1233_p1, %p42_p0  ;;  %p163_p7 = scmp.lt.s32.totalorder %s944_s21, 3 }
   0xa   : > { %p1020_p6 = por %p156_p3, %p42_p0  ;;  %s946_s27 = smov [#allocation5]  }
   0xb   : > { %s1236_s24 = scalar_select %p1015_p4, 1, 0 }
   0xc   : > { %s1237_s25 = scalar_select %p1020_p6, 1, 0 }
   0xd   : > { %p1025_p8 = pnand %p601_p5, %p163_p7  ;;  %s175_s28 = sshll.u32 %s946_s27, 4  ;;  %s1029_s28 = int_to_ptr.vmem [resolvable:$true] %s175_s28 }
   0xe   : > { %s947_s30 = smov [#allocation7]   ;;  %s788_s9 = scalar_lea.hbm %s1228_s1, 4096 }
   0xf   : > { %p728_p9 = pneg %p1025_p8  ;;  %s191_s6 = sshll.u32 %s947_s30, 4  ;;  %s1040_s6 = int_to_ptr.vmem [resolvable:$true] %s191_s6 }
  0x10   : > { %p789_p12 = scmp.ne.s32.totalorder %s1228_s1, %s788_s9  ;;  %p795_p5 = scmp.lt.u32.totalorder %s788_s9, %s1228_s1 }
  0x11   : > { %p1036_p11 = pnand %p728_p9, %p1233_p1 }
  0x13   : > { %p790_p13 = pneg %p1036_p11 }
  0x15   : > { %p791_p0 = pnand %p790_p13, %p789_p12 }
  0x17   : > { %p792_p3 = pneg %p791_p0 }
  0x19   : > { %p797_p7 = pnand %p795_p5, %p792_p3 }
  0x1b   : > { %800 = shalt.err (!%p797_p7)
}
  0x1c   : > { %s801_s14 = scalar_lea.vmem %s1029_s28, 4096  ;;  %p809_p2 = scmp.lt.s32.totalorder %s1029_s28, %s1029_s28 }
  0x1d   : > { %p802_p9 = scmp.ne.s32.totalorder %s1029_s28, %s801_s14  ;;  %p810_p12 = scmp.lt.s32.totalorder %s801_s14, %s801_s14 }
  0x1f   : > { %p804_p10 = pnand %p802_p9, %p790_p13  ;;  %p811_p0 = por %p810_p12, %p809_p2 }
  0x21   : > { %p805_p1 = pneg %p804_p10 }
  0x23   : > { %p812_p6 = pnand %p811_p0, %p805_p1 }
  0x25   : > { %815 = shalt.err (!%p812_p6)
}
  0x26   : > { %s948_s15 = smov 256   ;;  %s949_s16 = smov 16  }
  0x27   : > { %731 = dma.hbm_to_vmem [thread:$0]  (!%p1036_p11), %s1228_s1, 4096, %s1029_s28, [#allocation6], %s948_s15, %s948_s15, %s949_s16  }
  0x28   : > { %s816_s7 = scalar_lea.hbm %s1230_s3, 4096 }
  0x29   : > { %p817_p2 = scmp.ne.s32.totalorder %s1230_s3, %s816_s7  ;;  %p823_p10 = scmp.lt.u32.totalorder %s816_s7, %s1230_s3 }
  0x2b   : > { %p819_p1 = pnand %p817_p2, %p790_p13 }
  0x2d   : > { %p820_p6 = pneg %p819_p1 }
  0x2f   : > { %p825_p3 = pnand %p823_p10, %p820_p6 }
  0x31   : > { %828 = shalt.err (!%p825_p3)
}
  0x32   : > { %s829_s28 = scalar_lea.vmem %s1040_s6, 4096  ;;  %p837_p12 = scmp.lt.s32.totalorder %s1040_s6, %s1040_s6 }
  0x33   : > { %p830_p5 = scmp.ne.s32.totalorder %s1040_s6, %s829_s28  ;;  %p838_p0 = scmp.lt.s32.totalorder %s829_s28, %s829_s28 }
  0x35   : > { %p832_p7 = pnand %p830_p5, %p790_p13  ;;  %p839_p2 = por %p838_p0, %p837_p12 }
  0x37   : > { %p833_p9 = pneg %p832_p7 }
  0x39   : > { %p840_p1 = pnand %p839_p2, %p833_p9 }
  0x3b   : > { %843 = shalt.err (!%p840_p1)
}
  0x3c   : > { %s950_s12 = smov 128   ;;  %s951_s13 = smov 8  }
  0x3d   : > { %734 = dma.hbm_to_vmem [thread:$0]  (!%p1036_p11), %s1230_s3, 4096, %s1040_s6, [#allocation6], %s950_s12, %s950_s12, %s951_s13  }
  0x3e   : > { %s1095_s16 = sadd.s32 1, %s944_s21   ;;  %s29_s23 = sadd.s32 1, %s940_s20 }
  0x3f   : > { %s26_s17 = ssub.s32 %s944_s21, %s1095_s16  ;;  %p36_p6 = scmp.ne.s32.totalorder %s940_s20, %s936_s19 }
  0x40   : > { %p27_p13 = scmp.eq.s32.totalorder %s26_s17, 0  ;;  %p37_p10 = scmp.eq.s32.totalorder %s944_s21, 0 }
  0x41   : > { %p1240_p5 = scmp.eq.s32.totalorder %s1006_s22, 1  ;;  %p745_p9 = scmp.lt.s32.totalorder %s944_s21, 2 }
  0x42   : > { %s1104_s27 = scalar_select %p27_p13, %s940_s20, %s29_s23  }
  0x43   : > { %p38_p3 = por %p37_p10, %p36_p6  ;;  %p1108_p7 = por %p1240_p5, %p36_p6 }
  0x44   : > { %s208_s29 = sand.u32 1, %s940_s20   ;;  %s606_s6 = sshll.u32 %s944_s21, 7 }
  0x45   : > { %s1241_s30 = scalar_select %p1108_p7, 1, 0 }
  0x46   : > { %s605_s7 = sshll.u32 %s208_s29, 3  ;;  %s1118_s10 = scalar_lea.hbm %s1227_s0, %s606_s6 }
  0x47   : > { %s212_s11 = scalar_lea.vmem [#allocation2], %s605_s7  ;;  %p1122_p11 = pnand %p745_p9, %p38_p3 }
  0x48   : > { %s219_s28 = sshll.u32 %s212_s11, 4  ;;  %s209_s13 = scalar_lea.sflag [#allocation3], %s208_s29  ;;  %s1120_s28 = int_to_ptr.vmem [resolvable:$true] %s219_s28 }
  0x49   : > { %s844_s14 = scalar_lea.hbm %s1118_s10, 128  ;;  %p846_p0 = pneg %p1122_p11 }
  0x4a   : > { %p845_p12 = scmp.ne.s32.totalorder %s1118_s10, %s844_s14  ;;  %s849_s23 = scalar_lea.hbm %s1227_s0, 256 }
  0x4b   : > { %p850_p13 = scmp.lt.u32.totalorder %s1118_s10, %s1227_s0  ;;  %p851_p6 = scmp.lt.u32.totalorder %s849_s23, %s844_s14 }
  0x4c   : > { %p847_p2 = pnand %p846_p0, %p845_p12  ;;  %p853_p3 = scmp.lt.u32.totalorder %s844_s14, %s1118_s10 }
  0x4d   : > { %p852_p10 = por %p851_p6, %p850_p13 }
  0x4e   : > { %p848_p1 = pneg %p847_p2 }
  0x4f   : > { %p854_p5 = por %p853_p3, %p852_p10 }
  0x51   : > { %p855_p9 = pnand %p854_p5, %p848_p1 }
  0x53   : > { %858 = shalt.err (!%p855_p9)
}
  0x54   : > { %s859_s29 = scalar_lea.vmem %s1120_s28, 128  ;;  %s952_s8 = smov [#allocation2]  }
  0x55   : > { %p860_p12 = scmp.ne.s32.totalorder %s1120_s28, %s859_s29  ;;  %s864_s9 = sshll.u32 %s952_s8, 4  ;;  %s865_s9 = int_to_ptr.vmem [resolvable:$false] %s864_s9 }
  0x56   : > { %s866_s11 = scalar_lea.vmem %s865_s9, 256  ;;  %p867_p4 = scmp.lt.s32.totalorder %s1120_s28, %s865_s9 }
  0x57   : > { %p862_p2 = pnand %p860_p12, %p846_p0  ;;  %p868_p13 = scmp.lt.s32.totalorder %s866_s11, %s859_s29 }
  0x59   : > { %p863_p7 = pneg %p862_p2  ;;  %p869_p6 = por %p868_p13, %p867_p4 }
  0x5b   : > { %p870_p10 = pnand %p869_p6, %p863_p7 }
  0x5d   : > { %873 = shalt.err (!%p870_p10)
}
  0x5e   : > { %738 = dma.hbm_to_vmem [thread:$0]  (!%p1122_p11), %s1118_s10, 128, %s1120_s28, %s209_s13  }
  0x5f   : > { %228 = sbr.rel (%p1025_p8) target bundleno = 590 (0x24e), region = 40  ;;  %s1154_s14 = sand.u32 (!%p1025_p8), 1, %s936_s19  }
  0x60   : > { %s608_s15 = sshll.u32 (!%p1025_p8), %s1154_s14, 3  ;;  %s231_s17 = scalar_lea.sflag (!%p1025_p8), [#allocation3], %s1154_s14 }
  0x61   : > { %s1160_s23 = scalar_lea.vmem (!%p1025_p8), [#allocation2], %s608_s15  ;;  %p1243_p4 = scmp.ne.s32.totalorder (!%p1025_p8), %s1236_s24, 0 }
  0x66   : > { %919 = dma.done.wait (%p1243_p4), %s231_s17, 128  }
  0x67   : > { %921 = vsyncadd (%p1243_p4), %s231_s17, 4294967168  ;;  %p1244_p7 = scmp.eq.s32.totalorder %s1006_s22, 0 }
  0x69   : > { %923 = dma.done.wait (%p1244_p7), [#allocation6], 8192   ;;  %p1245_p8 = pmov %p1244_p7 }
  0x6a   : > { %v953_v0 = vmov 0.0   ;;  %v271_v1 = vld [vmem:[#allocation5 + $0x8] sm:$0xff]  ;;  %v273_v2 = vld [vmem:[#allocation5 + $0x18] sm:$0xff]  ;;  %v270_v3 = vld [vmem:[#allocation5] sm:$0xff]  ;;  %s614_s12 = sshll.u32 %s1006_s22, 7  ;;  %s268_s13 = scalar_lea.vmem [#allocation8], %s608_s15 }
  0x6b   : > { %925 = vsyncadd (%p1245_p8), [#allocation6], 4294959104  ;;  %378 = vmatprep.mubr.f32.mxu0 %v953_v0  ;;  %v652_v4 = vpack.c.bf16 %v273_v2, %v271_v1  ;;  %v272_v5 = vld [vmem:[#allocation5 + $0x10] sm:$0xff]  ;;  %v275_v6 = vld [vmem:[#allocation5 + $0x28] sm:$0xff]  ;;  %s511_s7 = sshll.u32 %s268_s13, 4  ;;  %s1183_s8 = scalar_lea.hbm %s1232_s5, %s614_s12  ;;  %s1185_s7 = int_to_ptr.vmem [resolvable:$true] %s511_s7 }
  0x6c   : > { %v277_v7 = vld [vmem:[#allocation5 + $0x38] sm:$0xff]  ;;  %v654_v8 = vpack.c.bf16 %v272_v5, %v270_v3  ;;  %v274_v10 = vld [vmem:[#allocation5 + $0x20] sm:$0xff]  ;;  %v276_v11 = vld [vmem:[#allocation5 + $0x30] sm:$0xff]  ;;  %s498_s9 = scalar_lea.sflag [#allocation4], %s1154_s14  ;;  %s874_s11 = scalar_lea.vmem %s1185_s7, 128 }
  0x6d   : > { %v656_v9 = vpack.c.bf16 %v277_v7, %v275_v6  ;;  %v279_v12 = vld [vmem:[#allocation5 + $0x48] sm:$0xff]  ;;  %653 = vmatprep.subr.bf16.mxu0 %v652_v4  ;;  %v281_v13 = vld [vmem:[#allocation5 + $0x58] sm:$0xff]  ;;  %v658_v14 = vpack.c.bf16 %v276_v11, %v274_v10  ;;  %v278_v16 = vld [vmem:[#allocation5 + $0x40] sm:$0xff]  ;;  %p875_p11 = scmp.ne.s32.totalorder %s1185_s7, %s874_s11  ;;  %p1246_p0 = scmp.ne.s32.totalorder %s1241_s30, 0 }
  0x6e   : > { %655 = vmatpush1.bf16.msra.mxu0 %v654_v8  ;;  %v660_v15 = vpack.c.bf16 %v281_v13, %v279_v12  ;;  %v280_v17 = vld [vmem:[#allocation5 + $0x50] sm:$0xff]  ;;  %v283_v18 = vld [vmem:[#allocation5 + $0x68] sm:$0xff]  ;;  %v285_v19 = vld [vmem:[#allocation5 + $0x78] sm:$0xff]  ;;  %s954_s22 = smov [#allocation8]  }
  0x6f   : > { %657 = vmatprep.subr.bf16.mxu0 %v656_v9  ;;  %v662_v20 = vpack.c.bf16 %v280_v17, %v278_v16  ;;  %v664_v21 = vpack.c.bf16 %v285_v19, %v283_v18  ;;  %v282_v22 = vld [vmem:[#allocation5 + $0x60] sm:$0xff]  ;;  %v284_v23 = vld [vmem:[#allocation5 + $0x70] sm:$0xff]  ;;  %v287_v24 = vld [vmem:[#allocation5 + $0x88] sm:$0xff]  ;;  %p876_p1 = pnand %p875_p11, %p1246_p0  ;;  %s878_s15 = sshll.u32 %s954_s22, 4  ;;  %s879_s15 = int_to_ptr.vmem [resolvable:$false] %s878_s15 }
  0x70   : > { %v289_v25 = vld [vmem:[#allocation5 + $0x98] sm:$0xff]  ;;  %v286_v26 = vld [vmem:[#allocation5 + $0x80] sm:$0xff]  ;;  %v288_v27 = vld [vmem:[#allocation5 + $0x90] sm:$0xff]  ;;  %v666_v31 = vpack.c.bf16 %v284_v23, %v282_v22  ;;  %s880_s17 = scalar_lea.vmem %s879_s15, 256  ;;  %p881_p5 = scmp.lt.s32.totalorder %s1185_s7, %s879_s15 }
  0x71   : > { %v403_v28 = vld [vmem:[#allocation7 + $0x80] sm:$0xff]  ;;  %v404_v29 = vld [vmem:[#allocation7 + $0x88] sm:$0xff]  ;;  %v405_v34 = vld [vmem:[#allocation7 + $0x90] sm:$0xff]  ;;  %v668_v36 = vpack.c.bf16 %v289_v25, %v287_v24  ;;  %v670_v46 = vpack.c.bf16 %v288_v27, %v286_v26  ;;  %p877_p3 = pneg %p876_p1  ;;  %p882_p9 = scmp.lt.s32.totalorder %s880_s17, %s874_s11 }
  0x72   : > { %659 = vmatpush1.bf16.msra.mxu0 %v658_v14  ;;  %v387_v30 = vld [vmem:[#allocation7] sm:$0xff]  ;;  %v684_v32 = vpack.c.bf16 %v404_v29, %v403_v28  ;;  %v388_v33 = vld [vmem:[#allocation7 + $0x8] sm:$0xff]  ;;  %v406_v35 = vld [vmem:[#allocation7 + $0x98] sm:$0xff] }
  0x73   : > { %661 = vmatprep.subr.bf16.mxu0 %v660_v15  ;;  %v686_v37 = vpack.c.bf16 %v388_v33, %v387_v30  ;;  %v688_v38 = vpack.c.bf16 %v406_v35, %v405_v34  ;;  %v389_v39 = vld [vmem:[#allocation7 + $0x10] sm:$0xff]  ;;  %v390_v40 = vld [vmem:[#allocation7 + $0x18] sm:$0xff]  ;;  %v407_v41 = vld [vmem:[#allocation7 + $0xa0] sm:$0xff]  ;;  %v304_v34 = vlaneseq  ;;  %p883_p12 = por %p882_p9, %p881_p5 }
  0x74   : > { %v291_v42 = vld [vmem:[#allocation5 + $0xa8] sm:$0xff]  ;;  %v293_v43 = vld [vmem:[#allocation5 + $0xb8] sm:$0xff]  ;;  %685 = vmatprep.subr.bf16.mxu1 %v684_v32  ;;  %v690_v45 = vpack.c.bf16 %v390_v40, %v389_v39  ;;  %v290_v47 = vld [vmem:[#allocation5 + $0xa0] sm:$0xff] }
  0x75   : > { %v408_v44 = vld [vmem:[#allocation7 + $0xa8] sm:$0xff]  ;;  %687 = vmatpush3.bf16.msra.mxu1 %v686_v37  ;;  %v391_v49 = vld [vmem:[#allocation7 + $0x20] sm:$0xff]  ;;  %v672_v51 = vpack.c.bf16 %v293_v43, %v291_v42  ;;  %v292_v52 = vld [vmem:[#allocation5 + $0xb0] sm:$0xff]  ;;  %v305_v35 = vshrl.u32 %v304_v34, 7  ;;  %p884_p2 = pnand %p883_p12, %p877_p3 }
  0x76   : > { %663 = vmatpush1.bf16.msra.mxu0 %v662_v20  ;;  %689 = vmatprep.subr.bf16.mxu1 %v688_v38  ;;  %v692_v48 = vpack.c.bf16 %v408_v44, %v407_v41  ;;  %v392_v50 = vld [vmem:[#allocation7 + $0x28] sm:$0xff]  ;;  %v409_v53 = vld [vmem:[#allocation7 + $0xb0] sm:$0xff]  ;;  %v410_v54 = vld [vmem:[#allocation7 + $0xb8] sm:$0xff]  ;;  %v674_v58 = vpack.c.bf16 %v292_v52, %v290_v47 }
  0x77   : > { %665 = vmatprep.subr.bf16.mxu0 %v664_v21  ;;  %v295_v55 = vld [vmem:[#allocation5 + $0xc8] sm:$0xff]  ;;  %v297_v56 = vld [vmem:[#allocation5 + $0xd8] sm:$0xff]  ;;  %v694_v57 = vpack.c.bf16 %v392_v50, %v391_v49  ;;  %v294_v59 = vld [vmem:[#allocation5 + $0xc0] sm:$0xff]  ;;  %v696_v60 = vpack.c.bf16 %v410_v54, %v409_v53  ;;  %v310_v38 = vsub.s32 1, %v305_v35 }
  0x78   : > { %v393_v61 = vld [vmem:[#allocation7 + $0x30] sm:$0xff]  ;;  %v394_v62 = vld [vmem:[#allocation7 + $0x38] sm:$0xff]  ;;  %v676_v63 = vpack.c.bf16 %v297_v56, %v295_v55  ;;  %v411_v1 = vld [vmem:[#allocation7 + $0xc0] sm:$0xff] }
  0x79   : > { %691 = vmatpush3.bf16.msra.mxu1 %v690_v45  ;;  %v296_v0 = vld [vmem:[#allocation5 + $0xd0] sm:$0xff]  ;;  %v412_v2 = vld [vmem:[#allocation7 + $0xc8] sm:$0xff]  ;;  %v301_v4 = vld [vmem:[#allocation5 + $0xf8] sm:$0xff]  ;;  %v698_v5 = vpack.c.bf16 %v394_v62, %v393_v61 }
  0x7a   : > { %667 = vmatpush1.bf16.msra.mxu0 %v666_v31  ;;  %693 = vmatprep.subr.bf16.mxu1 %v692_v48  ;;  %v299_v3 = vld [vmem:[#allocation5 + $0xe8] sm:$0xff]  ;;  %v678_v6 = vpack.c.bf16 %v296_v0, %v294_v59  ;;  %v298_v7 = vld [vmem:[#allocation5 + $0xe0] sm:$0xff]  ;;  %v700_v8 = vpack.c.bf16 %v412_v2, %v411_v1  ;;  %v300_v12 = vld [vmem:[#allocation5 + $0xf0] sm:$0xff] }
  0x7b   : > { %669 = vmatprep.subr.bf16.mxu0 %v668_v36  ;;  %v395_v9 = vld [vmem:[#allocation7 + $0x40] sm:$0xff]  ;;  %v396_v10 = vld [vmem:[#allocation7 + $0x48] sm:$0xff]  ;;  %v680_v11 = vpack.c.bf16 %v301_v4, %v299_v3  ;;  %v413_v13 = vld [vmem:[#allocation7 + $0xd0] sm:$0xff]  ;;  %v682_v16 = vpack.c.bf16 %v300_v12, %v298_v7  ;;  %v306_v36 = vsub.s32 0, %v305_v35 }
  0x7c   : > { %v414_v14 = vld [vmem:[#allocation7 + $0xd8] sm:$0xff]  ;;  %v702_v15 = vpack.c.bf16 %v396_v10, %v395_v9  ;;  %v397_v18 = vld [vmem:[#allocation7 + $0x50] sm:$0xff]  ;;  %v415_v20 = vld [vmem:[#allocation7 + $0xe0] sm:$0xff] }
  0x7d   : > { %695 = vmatpush3.bf16.msra.mxu1 %v694_v57  ;;  %v704_v17 = vpack.c.bf16 %v414_v14, %v413_v13  ;;  %v398_v19 = vld [vmem:[#allocation7 + $0x58] sm:$0xff]  ;;  %v416_v21 = vld [vmem:[#allocation7 + $0xe8] sm:$0xff]  ;;  %v399_v25 = vld [vmem:[#allocation7 + $0x60] sm:$0xff] }
  0x7e   : > { %671 = vmatpush1.bf16.msra.mxu0 %v670_v46  ;;  %697 = vmatprep.subr.bf16.mxu1 %v696_v60  ;;  %v706_v22 = vpack.c.bf16 %v398_v19, %v397_v18  ;;  %v269_v23 = vld [vmem:[%s1160_s23] sm:$0xff]  ;;  %v708_v24 = vpack.c.bf16 %v416_v21, %v415_v20  ;;  %v400_v26 = vld [vmem:[#allocation7 + $0x68] sm:$0xff] }
  0x7f   : > { %673 = vmatprep.subr.bf16.mxu0 %v672_v51  ;;  %v710_v27 = vpack.c.bf16 %v400_v26, %v399_v25  ;;  %v417_v28 = vld [vmem:[#allocation7 + $0xf0] sm:$0xff]  ;;  %v418_v29 = vld [vmem:[#allocation7 + $0xf8] sm:$0xff] }
  0x80   : > { %v712_v30 = vpack.c.bf16 %v418_v29, %v417_v28  ;;  %v401_v31 = vld [vmem:[#allocation7 + $0x70] sm:$0xff]  ;;  %v402_v32 = vld [vmem:[#allocation7 + $0x78] sm:$0xff] }
  0x81   : > { %699 = vmatpush3.bf16.msra.mxu1 %v698_v5  ;;  %v714_v33 = vpack.c.bf16 %v402_v32, %v401_v31  ;;  %v302_v37 = vld [vmem:[%s1229_s2] sm:$0x3] }
  0x82   : > { %675 = vmatpush1.bf16.msra.mxu0 %v674_v58  ;;  %701 = vmatprep.subr.bf16.mxu1 %v700_v8  ;;  %v307_v39 = vrot.slane %v302_v37, %v306_v36  ;;  %v311_v40 = vrot.slane %v302_v37, %v310_v38  ;;  %v612_v48 = vld [vmem:[%s1231_s4] ss:$0 sm:$0xff] }
  0x83   : > { %677 = vmatprep.subr.bf16.mxu0 %v676_v63 }
  0x85   : > { %703 = vmatpush3.bf16.msra.mxu1 %v702_v15 }
  0x86   : > { %679 = vmatpush1.bf16.msra.mxu0 %v678_v6  ;;  %705 = vmatprep.subr.bf16.mxu1 %v704_v17 }
  0x87   : > { %681 = vmatprep.subr.bf16.mxu0 %v680_v11 }
  0x89   : > { %707 = vmatpush3.bf16.msra.mxu1 %v706_v22 }
  0x8a   : > { %683 = vmatpush1.bf16.msra.mxu0 %v682_v16  ;;  %709 = vmatprep.subr.bf16.mxu1 %v708_v24 }
  0x8d   : > { %379 = vmatmul.mubr.f32.vlgmr.msra.gmra.mrb[0].mxu0 %v269_v23  ;;  %711 = vmatpush3.bf16.msra.mxu1 %v710_v27 }
  0x8e   : > { %713 = vmatprep.subr.bf16.mxu1 %v712_v30 }
  0x91   : > { %715 = vmatpush3.bf16.msra.mxu1 %v714_v33 }
 0x160   : > { %v380_v41 = vpop.f32.mrb[0].mxu0 }
 0x161   : > { %v381_v42 = vadd.f32 %v380_v41, %v307_v39  ;;  %v382_v43 = vpop.f32.mrb[1].mxu0 }
 0x162   : > { %v383_v44 = vadd.f32 %v382_v43, %v311_v40 }
 0x163   : > { %v385_v46 = vmax.f32 %v381_v42, 0.0 }
 0x164   : > { %v386_v45 = vmax.f32 %v383_v44, 0.0 }
 0x166   : > { %490 = vmatprep.mubr.f32.mxu1 %v386_v45 }
 0x167   : > { %491 = vmatmul.mubr.f32.vlgmr.msra.gmra.mrb[0].mxu1 %v385_v46 }
 0x23a   : > { %v649_v47 = vpop.f32.mrb[0].mxu1 }
 0x23b   : > { %v650_v49 = vpop.f32.mrb[1].mxu1 }
 0x23c   : > { %v651_v50 = vadd.f32 %v650_v49, %v649_v47 }
 0x23e   : > { %v493_v51 = vadd.f32 %v651_v50, %v612_v48 }
 0x240   : > { %496 = vst [vmem:[%s268_s13] sm:$0xff] %v493_v51 }
 0x241   : > { %887 = shalt.err (!%p884_p2)
}
 0x242   : > { %s888_s14 = scalar_lea.hbm %s1183_s8, 128  ;;  %s892_s26 = scalar_lea.hbm %s1232_s5, 256 }
 0x243   : > { %p889_p13 = scmp.ne.s32.totalorder %s1183_s8, %s888_s14  ;;  %p893_p4 = scmp.lt.u32.totalorder %s1183_s8, %s1232_s5 }
 0x244   : > { %p894_p7 = scmp.lt.u32.totalorder %s892_s26, %s888_s14  ;;  %p896_p11 = scmp.lt.u32.totalorder %s888_s14, %s1183_s8 }
 0x245   : > { %p890_p6 = pnand %p889_p13, %p1246_p0 }
 0x246   : > { %p895_p8 = por %p894_p7, %p893_p4 }
 0x247   : > { %p891_p10 = pneg %p890_p6 }
 0x248   : > { %p897_p1 = por %p896_p11, %p895_p8 }
 0x24a   : > { %p898_p3 = pnand %p897_p1, %p891_p10 }
 0x24c   : > { %901 = shalt.err (!%p898_p3)
}
 0x24d   : > { %726 = dma.vmem_to_hbm [thread:$0]  (%p1246_p0), %s1185_s7, 128, %s1183_s8, %s498_s9  }
 0x24e PF: > { %s523_s12 = sand.u32 1, %s932_s18   ;;  %p1247_p5 = scmp.ne.s32.totalorder %s1237_s25, 0 }
 0x24f   : > { %p1248_p9 = scmp.ge.s32.totalorder %s944_s21, 2  ;;  %s524_s13 = scalar_lea.sflag [#allocation4], %s523_s12 }
 0x251   : > { %p740_p12 = pnand %p1248_p9, %p1247_p5 }
 0x253   : > { %927 = dma.done.wait (!%p740_p12), %s524_s13, 128  }
 0x254   : > { %929 = vsyncadd (!%p740_p12), %s524_s13, 4294967168  ;;  %p19_p2 = scmp.ge.s32.totalorder %s1095_s16, 4   ;;  %s1249_s18 = smov %s936_s19 }
 0x255   : > { %s1250_s19 = smov %s940_s20  ;;  %s1251_s20 = smov %s1104_s27 }
 0x256   : > { %s1252_s21 = smov %s1095_s16  ;;  %21 = sbr.rel (!%p19_p2) target bundleno = 6 (0x6), region = 93 }
 0x25d   :  { %529 = vsyncpa [#allocation3], 1 }
 0x25e   :  { %531 = vsyncpa [#allocation3 + $0x1], 1 }
 0x25f   :  { %532 = vsyncpa [#allocation6], 1 }
 0x260   :  { %533 = vsyncpa [#allocation4], 1 }
 0x261   :  { %535 = vsyncpa [#allocation4 + $0x1], 1 }

</bundles_post_ra>
